<compile_context>
chip_gen: v7x
topology: tpu7x:2x2x1
jax: 0.10.0
libtpu: 0.0.40
codegen_flags: <defaults>
</compile_context>

<pallas_src>
import functools

import jax
import jax.numpy as jnp
import numpy as np
from jax.experimental import pallas as pl
from jax.experimental.pallas import tpu as pltpu


# -----------------------------------------------------------------------------
# Pallas kernel: one batch element per grid step.
# -----------------------------------------------------------------------------
def conv_lstm_kernel(p_ref, c_ref, w_ref, b_ref, h_out_ref, c_out_ref, *, C_hid):
    """
    p_ref : (1, K, HW)      bf16  im2col patches, K on sublanes, spatial on lanes
    c_ref : (1, C_hid, HW)  f32   previous cell state (flattened NCHW)
    w_ref : (4*C_hid, K)    bf16  gate-stacked conv weights
    b_ref : (4*C_hid, 1)    f32   gate-stacked conv bias
    h_out_ref, c_out_ref : (1, C_hid, HW) f32
    """
    # Single fused conv-as-matmul; f32 accumulation stays in the MXU path.
    acc = jnp.dot(w_ref[...], p_ref[0], preferred_element_type=jnp.float32)
    acc = acc + b_ref[...]                       # (4*C_hid, HW) + (4*C_hid, 1)

    # Gates are sublane blocks (order i, f, o, g — matches the torch module).
    # All transcendental / VPU work runs at full lane width (HW lanes).
    sig = jax.nn.sigmoid(acc[: 3 * C_hid, :])    # i, f, o activated together
    g = jnp.tanh(acc[3 * C_hid:, :])

    i = sig[0 * C_hid:1 * C_hid, :]
    f = sig[1 * C_hid:2 * C_hid, :]
    o = sig[2 * C_hid:3 * C_hid, :]

    c_cur = c_ref[0]                             # (C_hid, HW) f32
    c_next = f * c_cur + i * g
    h_next = o * jnp.tanh(c_next)

    h_out_ref[0] = h_next.astype(h_out_ref.dtype)
    c_out_ref[0] = c_next.astype(c_out_ref.dtype)


# -----------------------------------------------------------------------------
# VMEM accounting with TPU sublane/lane padding.
# -----------------------------------------------------------------------------
def _padded_block_bytes(shape, dtype):
    itemsize = np.dtype(dtype).itemsize
    sub_mult = 8 * max(1, 4 // itemsize)         # 8 for f32, 16 for bf16
    shape = tuple(shape)
    if len(shape) == 1:
        shape = (1,) + shape
    lead = int(np.prod(shape[:-2])) if len(shape) > 2 else 1
    s = -(-shape[-2] // sub_mult) * sub_mult
    l = -(-shape[-1] // 128) * 128
    return lead * s * l * itemsize


# -----------------------------------------------------------------------------
# Wrapper: NCHW torch-style in/out, im2col + dtype prep, pallas_call.
# -----------------------------------------------------------------------------
@jax.jit
def conv_lstm_cell_forward(x, h, c, weight, bias):
    """x: (B, C_in, H, W); h, c: (B, C_hid, H, W);
    weight: (4*C_hid, C_in + C_hid, KH, KW)  (torch Conv2d layout);
    bias: (4*C_hid,) or None."""
    B, C_in, H, W = x.shape
    C4, C_cat_w, KH, KW = weight.shape
    C_hid = C4 // 4
    C_cat = C_in + C_hid
    assert C_cat_w == C_cat
    assert KH % 2 == 1 and KW % 2 == 1, (
        "padding=k//2 is 'same' only for odd kernel sizes")
    HW = H * W
    K_tot = KH * KW * C_cat
    ph, pw = KH // 2, KW // 2

    # ---- wrapper-side layout plumbing: NHWC concat, pad, full im2col -------
    x_nhwc = jnp.transpose(x, (0, 2, 3, 1))
    h_nhwc = jnp.transpose(h, (0, 2, 3, 1))
    comb = jnp.concatenate([x_nhwc, h_nhwc], axis=-1).astype(jnp.bfloat16)
    comb_p = jnp.pad(comb, ((0, 0), (ph, ph), (pw, pw), (0, 0)))

    taps = [comb_p[:, dy:dy + H, dx:dx + W, :]
            for dy in range(KH) for dx in range(KW)]           # (B,H,W,C_cat)
    patches = jnp.concatenate(taps, axis=-1)                   # (B,H,W,K_tot)
    patches_t = jnp.transpose(patches.reshape(B, HW, K_tot), (0, 2, 1))

    # Gate-stacked weights, tap-major K ordering matching `patches`: k =
    # dy*(KW*C_cat) + dx*C_cat + cc.
    w2 = jnp.transpose(weight, (0, 2, 3, 1)).reshape(4 * C_hid, K_tot)
    w2 = w2.astype(jnp.bfloat16)

    if bias is None:
        b2 = jnp.zeros((4 * C_hid, 1), jnp.float32)
    else:
        b2 = bias.reshape(4 * C_hid, 1).astype(jnp.float32)

    # Cell state: flattened NCHW (lane-dense, last dim = HW). Free reshape.
    c_in = c.reshape(B, C_hid, HW).astype(jnp.float32)

    # ---- VMEM budget from PADDED tile sizes, double-buffered ----------------
    in_blocks = [((1, K_tot, HW), jnp.bfloat16),
                 ((1, C_hid, HW), jnp.float32),
                 ((4 * C_hid, K_tot), jnp.bfloat16),
                 ((4 * C_hid, 1), jnp.float32)]
    out_blocks = [((1, C_hid, HW), jnp.float32)] * 2
    block_bytes = sum(_padded_block_bytes(s, d) for s, d in in_blocks + out_blocks)
    # live in-kernel temporaries (acc + activations), padded
    scratch_bytes = 4 * _padded_block_bytes((4 * C_hid, HW), jnp.float32)
    vmem_limit = 2 * (2 * block_bytes + scratch_bytes) + (4 << 20)
    vmem_limit = int(min(max(vmem_limit, 16 << 20), 64 << 20))   # v7x-safe cap

    flops = 2 * B * HW * K_tot * (4 * C_hid) + 6 * B * HW * C_hid
    transcendentals = 5 * B * HW * C_hid
    bytes_accessed = (patches_t.size * 2 + c_in.size * 4 + w2.size * 2
                      + b2.size * 4 + 2 * B * HW * C_hid * 4)

    kernel = functools.partial(conv_lstm_kernel, C_hid=C_hid)

    h_flat, c_flat = pl.pallas_call(
        kernel,
        grid=(B,),
        in_specs=[
            pl.BlockSpec((1, K_tot, HW), lambda b: (b, 0, 0)),
            pl.BlockSpec((1, C_hid, HW), lambda b: (b, 0, 0)),
            pl.BlockSpec((4 * C_hid, K_tot), lambda b: (0, 0)),
            pl.BlockSpec((4 * C_hid, 1), lambda b: (0, 0)),
        ],
        out_specs=(
            pl.BlockSpec((1, C_hid, HW), lambda b: (b, 0, 0)),
            pl.BlockSpec((1, C_hid, HW), lambda b: (b, 0, 0)),
        ),
        out_shape=(
            jax.ShapeDtypeStruct((B, C_hid, HW), jnp.float32),
            jax.ShapeDtypeStruct((B, C_hid, HW), jnp.float32),
        ),
        input_output_aliases={1: 1},   # c_cur buffer reused for c_next
        compiler_params=pltpu.CompilerParams(
            dimension_semantics=("parallel",),
            vmem_limit_bytes=vmem_limit,
        ),
        cost_estimate=pl.CostEstimate(
            flops=int(flops),
            transcendentals=int(transcendentals),
            bytes_accessed=int(bytes_accessed),
        ),
    )(patches_t, c_in, w2, b2)

    # Outputs are already flattened NCHW — free reshapes back to (B,C,H,W).
    h_next = h_flat.reshape(B, C_hid, H, W)
    c_next = c_flat.reshape(B, C_hid, H, W)
    return h_next, c_next


# -----------------------------------------------------------------------------
# Pure-JAX reference (same math, bf16-rounded operands to match the kernel's
# bf16-operand / f32-accumulate matmul).
# -----------------------------------------------------------------------------
def reference_forward(x, h, c, weight, bias):
    comb = jnp.concatenate([x, h], axis=1)
    comb = comb.astype(jnp.bfloat16).astype(jnp.float32)
    w = weight.astype(jnp.bfloat16).astype(jnp.float32)
    out = jax.lax.conv_general_dilated(
        comb, w, window_strides=(1, 1), padding="SAME",
        dimension_numbers=("NCHW", "OIHW", "NCHW"),
        precision=jax.lax.Precision.HIGHEST)
    if bias is not None:
        out = out + bias[None, :, None, None]
    cc_i, cc_f, cc_o, cc_g = jnp.split(out, 4, axis=1)
    i = jax.nn.sigmoid(cc_i)
    f = jax.nn.sigmoid(cc_f)
    o = jax.nn.sigmoid(cc_o)
    g = jnp.tanh(cc_g)
    c_next = f * c + i * g
    h_next = o * jnp.tanh(c_next)
    return h_next, c_next


# -----------------------------------------------------------------------------
if __name__ == "__main__":
    key = jax.random.PRNGKey(0)
    kx, khid, kcell, kwgt, kbias = jax.random.split(key, 5)

    B, C_IN, C_HID, H, W = 2, 4, 32, 16, 16   # 4*C_HID = 128, H*W = 256 lanes
    KH = KW = 3

    x = jax.random.normal(kx, (B, C_IN, H, W), jnp.float32)
    h0 = jax.random.normal(khid, (B, C_HID, H, W), jnp.float32) * 0.1
    c0 = jax.random.normal(kcell, (B, C_HID, H, W), jnp.float32) * 0.1

    fan_in = (C_IN + C_HID) * KH * KW
    lim = float(np.sqrt(1.0 / fan_in))
    weight = jax.random.uniform(kwgt, (4 * C_HID, C_IN + C_HID, KH, KW),
                                jnp.float32, -lim, lim)
    bias = jax.random.uniform(kbias, (4 * C_HID,), jnp.float32, -lim, lim)

    h1, c1 = conv_lstm_cell_forward(x, h0, c0, weight, bias)
    jax.block_until_ready((h1, c1))

    h_expect, c_expect = reference_forward(x, h0, c0, weight, bias)
    np.testing.assert_allclose(np.asarray(h1), np.asarray(h_expect),
                               rtol=1e-2, atol=1e-2)
    np.testing.assert_allclose(np.asarray(c1), np.asarray(c_expect),
                               rtol=1e-2, atol=1e-2)

    print("KERNEL_OK")
</pallas_src>

<mosaic_0001>
module attributes {stable_mosaic.version = 11 : i64} {
  func.func @conv_lstm_kernel(%arg0: i32, %arg1: memref<1x324x256xbf16, #tpu.memory_space<vmem>>, %arg2: memref<1x32x256xf32, #tpu.memory_space<vmem>>, %arg3: memref<128x324xbf16, #tpu.memory_space<vmem>>, %arg4: memref<128x1xf32, #tpu.memory_space<vmem>>, %arg5: memref<1x32x256xf32, #tpu.memory_space<vmem>>, %arg6: memref<1x32x256xf32, #tpu.memory_space<vmem>>) attributes {dimension_semantics = [#tpu.dimension_semantics<parallel>], iteration_bounds = array<i64: 2>, scalar_prefetch = 0 : i64, scratch_operands = 0 : i64, tpu.core_type = #tpu.core_type<tc>, window_params = [{transform_indices = @transform_0, window_bounds = array<i64: 1, 324, 256>}, {transform_indices = @transform_1, window_bounds = array<i64: 1, 32, 256>}, {pipeline_mode = #tpu.pipeline_mode<synchronous>, transform_indices = @transform_2, window_bounds = array<i64: 128, 324>}, {pipeline_mode = #tpu.pipeline_mode<synchronous>, transform_indices = @transform_3, window_bounds = array<i64: 128, 1>}, {transform_indices = @transform_4, window_bounds = array<i64: 1, 32, 256>}, {transform_indices = @transform_5, window_bounds = array<i64: 1, 32, 256>}]} {
    %c0 = arith.constant 0 : index
    %c0_0 = arith.constant 0 : index
    %0 = vector.load %arg3[%c0, %c0_0] : memref<128x324xbf16, #tpu.memory_space<vmem>>, vector<128x324xbf16>
    %c0_1 = arith.constant 0 : index
    %c0_2 = arith.constant 0 : index
    %c0_3 = arith.constant 0 : index
    %1 = vector.load %arg1[%c0_1, %c0_2, %c0_3] : memref<1x324x256xbf16, #tpu.memory_space<vmem>>, vector<1x324x256xbf16>
    %2 = vector.shape_cast %1 : vector<1x324x256xbf16> to vector<324x256xbf16>
    %cst = arith.constant dense<0.000000e+00> : vector<128x256xf32>
    %3 = tpu.matmul %0, %2, %cst {dimension_numbers = #tpu.dot_dimension_numbers<[1], [0], [0], [1], [0, 0, 1, 1], [], []>} : vector<128x324xbf16>, vector<324x256xbf16>, vector<128x256xf32> -> vector<128x256xf32>
    %c0_4 = arith.constant 0 : index
    %c0_5 = arith.constant 0 : index
    %4 = vector.load %arg4[%c0_4, %c0_5] : memref<128x1xf32, #tpu.memory_space<vmem>>, vector<128x1xf32>
    %5 = vector.broadcast %4 : vector<128x1xf32> to vector<128x256xf32>
    %6 = arith.addf %3, %5 : vector<128x256xf32>
    %7 = vector.extract_strided_slice %6 {offsets = [0, 0], sizes = [96, 256], strides = [1, 1]} : vector<128x256xf32> to vector<96x256xf32>
    %8 = arith.negf %7 : vector<96x256xf32>
    %9 = math.exp %8 : vector<96x256xf32>
    %cst_6 = arith.constant 1.000000e+00 : f32
    %10 = vector.broadcast %cst_6 : f32 to vector<96x256xf32>
    %11 = arith.addf %10, %9 : vector<96x256xf32>
    %12 = arith.divf %10, %11 : vector<96x256xf32>
    %13 = vector.extract_strided_slice %6 {offsets = [96, 0], sizes = [32, 256], strides = [1, 1]} : vector<128x256xf32> to vector<32x256xf32>
    %14 = math.tanh %13 : vector<32x256xf32>
    %15 = vector.extract_strided_slice %12 {offsets = [0, 0], sizes = [32, 256], strides = [1, 1]} : vector<96x256xf32> to vector<32x256xf32>
    %16 = vector.extract_strided_slice %12 {offsets = [32, 0], sizes = [32, 256], strides = [1, 1]} : vector<96x256xf32> to vector<32x256xf32>
    %17 = vector.extract_strided_slice %12 {offsets = [64, 0], sizes = [32, 256], strides = [1, 1]} : vector<96x256xf32> to vector<32x256xf32>
    %c0_7 = arith.constant 0 : index
    %c0_8 = arith.constant 0 : index
    %c0_9 = arith.constant 0 : index
    %18 = vector.load %arg2[%c0_7, %c0_8, %c0_9] : memref<1x32x256xf32, #tpu.memory_space<vmem>>, vector<1x32x256xf32>
    %19 = vector.shape_cast %18 : vector<1x32x256xf32> to vector<32x256xf32>
    %20 = arith.mulf %16, %19 : vector<32x256xf32>
    %21 = arith.mulf %15, %14 : vector<32x256xf32>
    %22 = arith.addf %20, %21 : vector<32x256xf32>
    %23 = math.tanh %22 : vector<32x256xf32>
    %24 = arith.mulf %17, %23 : vector<32x256xf32>
    %c0_10 = arith.constant 0 : index
    %c0_11 = arith.constant 0 : index
    %c0_12 = arith.constant 0 : index
    %25 = vector.load %arg5[%c0_10, %c0_11, %c0_12] : memref<1x32x256xf32, #tpu.memory_space<vmem>>, vector<1x32x256xf32>
    %26 = vector.shape_cast %25 : vector<1x32x256xf32> to vector<32x256xf32>
    %27 = vector.shape_cast %24 : vector<32x256xf32> to vector<1x32x256xf32>
    tpu.vector_store %arg5[%c0_10, %c0_11, %c0_12], %27 {strides = array<i32>} : memref<1x32x256xf32, #tpu.memory_space<vmem>>, vector<1x32x256xf32>,
    %c0_13 = arith.constant 0 : index
    %c0_14 = arith.constant 0 : index
    %c0_15 = arith.constant 0 : index
    %28 = vector.load %arg6[%c0_13, %c0_14, %c0_15] : memref<1x32x256xf32, #tpu.memory_space<vmem>>, vector<1x32x256xf32>
    %29 = vector.shape_cast %28 : vector<1x32x256xf32> to vector<32x256xf32>
    %30 = vector.shape_cast %22 : vector<32x256xf32> to vector<1x32x256xf32>
    tpu.vector_store %arg6[%c0_13, %c0_14, %c0_15], %30 {strides = array<i32>} : memref<1x32x256xf32, #tpu.memory_space<vmem>>, vector<1x32x256xf32>,
    return
  }
  func.func @transform_0(%arg0: i32) -> (i32, i32, i32) {
    %c0_i32 = arith.constant 0 : i32
    %c0_i32_0 = arith.constant 0 : i32
    %c0_i32_1 = arith.constant 0 : i32
    return %arg0, %c0_i32, %c0_i32_0 : i32, i32, i32
  }
  func.func @transform_1(%arg0: i32) -> (i32, i32, i32) {
    %c0_i32 = arith.constant 0 : i32
    %c0_i32_0 = arith.constant 0 : i32
    %c0_i32_1 = arith.constant 0 : i32
    return %arg0, %c0_i32, %c0_i32_0 : i32, i32, i32
  }
  func.func @transform_2(%arg0: i32) -> (i32, i32) {
    %c0_i32 = arith.constant 0 : i32
    %c0_i32_0 = arith.constant 0 : i32
    %c0_i32_1 = arith.constant 0 : i32
    return %c0_i32, %c0_i32_0 : i32, i32
  }
  func.func @transform_3(%arg0: i32) -> (i32, i32) {
    %c0_i32 = arith.constant 0 : i32
    %c0_i32_0 = arith.constant 0 : i32
    %c0_i32_1 = arith.constant 0 : i32
    return %c0_i32, %c0_i32_0 : i32, i32
  }
  func.func @transform_4(%arg0: i32) -> (i32, i32, i32) {
    %c0_i32 = arith.constant 0 : i32
    %c0_i32_0 = arith.constant 0 : i32
    %c0_i32_1 = arith.constant 0 : i32
    return %arg0, %c0_i32, %c0_i32_0 : i32, i32, i32
  }
  func.func @transform_5(%arg0: i32) -> (i32, i32, i32) {
    %c0_i32 = arith.constant 0 : i32
    %c0_i32_0 = arith.constant 0 : i32
    %c0_i32_1 = arith.constant 0 : i32
    return %arg0, %c0_i32, %c0_i32_0 : i32, i32, i32
  }
}

</mosaic_0001>

<bundles_post_ra>
// kernel: conv_lstm_cell_forward.1
= control target key start
LH: loop header
LB: loop body
LE: loop exit
PB: predicated region body
PF: predicated region fallthrough
CT: control target
= control target key end

     0   :  { %s1780_s18 = smov 0   ;;  %s2134_s0 = inlined_call_operand.vmem [shape: bf16[2,324,256], index: 0, kind: input, shape index: {}]   ;;  %s2135_s1 = inlined_call_operand.vmem [shape: f32[2,32,256], index: 1, kind: input, shape index: {}, may-alias: {1,5}]   ;;  %s2136_s2 = inlined_call_operand.vmem [shape: bf16[128,324], index: 2, kind: input, shape index: {}]   ;;  %s2137_s3 = inlined_call_operand.vmem [shape: f32[128,1], index: 3, kind: input, shape index: {}]   ;;  %s2138_s4 = inlined_call_operand.vmem [shape: f32[2,32,256], index: 4, kind: output, shape index: {0}]   ;;  %s2139_s5 = inlined_call_operand.vmem [shape: f32[2,32,256], index: 5, kind: output, shape index: {1}, may-alias: {1,5}]  }
   0x1 LB: > { %s1327_s19 = sadd.s32 4294967295, %s1747_s18   ;;  %p1331_p0 = scmp.ge.s32.totalorder %s1747_s18, 1  ;;  %s1747_s18 = sphi %s1780_s18, %s16_s18  }
   0x2   : > { %p200_p1 = scmp.lt.s32.totalorder %s1747_s18, 3 }
   0x4   : > { %p201_p2 = pnand %p1331_p0, %p200_p1 }
   0x5   : > { %p238_p3 = scmp.lt.s32.totalorder (!%p201_p2), %s1327_s19, 1  ;;  %v1749_v0 = vmov (!%p201_p2), 0   ;;  %v1583_v1 = vld [vmem:[%s2136_s2 + $0x4] ss:$12 sps:$4 sm:$0xff] (!%p201_p2)   ;;  %vm778_vm0 = vcmask (!%p201_p2), 1041408   ;;  %vm753_vm1 = vcmask (!%p201_p2), 556032  }
   0x6   : > { %204 = sbr.rel (%p201_p2) target bundleno = 391 (0x187), region = 36  ;;  %930 = vmatprep.mubr.bf16.mxu0 (!%p201_p2), %v1749_v0  ;;  %1517 = vset.pattern.permute.xlu0 (!%p201_p2), %v1749_v0  ;;  %v1584_v33 = vld [vmem:[%s2136_s2 + $0x8] ss:$12 sps:$4 sm:$0xff] (!%p201_p2)   ;;  %v332_v37 = vld [vmem:[%s2137_s3] sm:$0xff] (!%p201_p2)  ;;  %v335_v42 = vld [vmem:[%s2137_s3 + $0x18] sm:$0xff] (!%p201_p2) }
   0x7   : > { %1518 = vset.pattern.permute.xlu1 (!%p201_p2), %v1749_v0  ;;  %817 = vmatprep.mubr.bf16.mxu1 (!%p201_p2), %v1583_v1  ;;  %v334_v38 = vld [vmem:[%s2137_s3 + $0x10] sm:$0xff] (!%p201_p2)  ;;  %v1587_v40 = vld [vmem:[%s2136_s2 + $0x20] ss:$12 sps:$4 sm:$0xff] (!%p201_p2)   ;;  %v1591_v49 = vld [vmem:[%s2136_s2 + $0x38] ss:$12 sps:$4 sm:$0xff] (!%p201_p2)  }
   0x8   : > { %350 = vperm.xlu0 (!%p201_p2), %1517, %v332_v37   ;;  %v333_v41 = vld [vmem:[%s2137_s3 + $0x8] sm:$0xff] (!%p201_p2)  ;;  %360 = vperm.xlu1 (!%p201_p2), %1518, %v334_v38   ;;  %v336_v45 = vld [vmem:[%s2137_s3 + $0x20] sm:$0xff] (!%p201_p2)  ;;  %v338_v50 = vld [vmem:[%s2137_s3 + $0x30] sm:$0xff] (!%p201_p2) }
   0x9   : > { %v337_v46 = vld [vmem:[%s2137_s3 + $0x28] sm:$0xff] (!%p201_p2)  ;;  %v339_v51 = vld [vmem:[%s2137_s3 + $0x38] sm:$0xff] (!%p201_p2)  ;;  %v340_v54 = vld [vmem:[%s2137_s3 + $0x40] sm:$0xff] (!%p201_p2) }
   0xa   : > { %v341_v55 = vld [vmem:[%s2137_s3 + $0x48] sm:$0xff] (!%p201_p2)  ;;  %v1595_v58 = vld [vmem:[%s2136_s2 + $0x50] ss:$12 sps:$4 sm:$0xff] (!%p201_p2)   ;;  %v344_v62 = vld [vmem:[%s2137_s3 + $0x60] sm:$0xff] (!%p201_p2) }
   0xb   : > { %v342_v59 = vld [vmem:[%s2137_s3 + $0x50] sm:$0xff] (!%p201_p2)  ;;  %v343_v60 = vld [vmem:[%s2137_s3 + $0x58] sm:$0xff] (!%p201_p2)  ;;  %v1581_v63 = vld [vmem:[%s2136_s2] ss:$12 sps:$4 sm:$0xff] (!%p201_p2)  }
   0xc   : > { %355 = vperm.xlu0 (!%p201_p2), %1517, %v333_v41   ;;  %365 = vperm.xlu1 (!%p201_p2), %1518, %v335_v42   ;;  %v345_v1 = vld [vmem:[%s2137_s3 + $0x68] sm:$0xff] (!%p201_p2) }
   0xd   : > { %s2141_s19 = smov (!%p238_p3, %s1327_s19), 1 }
   0xe   : > { %s1507_s22 = smul.u32 328, %s2141_s19  ;;  %s2061_s11 = sshll.u32 %s2141_s19, 6 }
   0xf   : > { %s2069_s14 = scalar_lea.vmem %s2135_s1, %s2061_s11  ;;  %s2085_s16 = scalar_lea.vmem %s2139_s5, %s2061_s11 }
  0x10   : > { %s1800_s25 = scalar_lea.vmem %s2134_s0, %s1507_s22  ;;  %370 = vperm.xlu0 %1517, %v336_v45   ;;  %375 = vperm.xlu1 %1518, %v337_v46   ;;  %s2115_s20 = scalar_lea.vmem %s2138_s4, %s2061_s11 }
  0x11   : > { %v1519_v2 = vld [vmem:[%s1800_s25 + $0x4] ss:$8 sps:$4 sm:$0xff]   ;;  %v1521_v3 = vld [vmem:[%s1800_s25] ss:$8 sps:$4 sm:$0xff]   ;;  %v1522_v4 = vld [vmem:[%s1800_s25 + $0x14] ss:$8 sps:$4 sm:$0xff]  }
  0x12   : > { %785 = vmatprep.subr.bf16.mxu1 %v1519_v2  ;;  %v1524_v5 = vld [vmem:[%s1800_s25 + $0x10] ss:$8 sps:$4 sm:$0xff]   ;;  %v1525_v6 = vld [vmem:[%s1800_s25 + $0x24] ss:$8 sps:$4 sm:$0xff]   ;;  %v1527_v7 = vld [vmem:[%s1800_s25 + $0x20] ss:$8 sps:$4 sm:$0xff]  }
  0x13   : > { %786 = vmatpush1.bf16.msra.mxu1 %v1521_v3  ;;  %v1528_v8 = vld [vmem:[%s1800_s25 + $0x34] ss:$8 sps:$4 sm:$0xff]   ;;  %v1530_v9 = vld [vmem:[%s1800_s25 + $0x30] ss:$8 sps:$4 sm:$0xff]   ;;  %v1531_v10 = vld [vmem:[%s1800_s25 + $0x44] ss:$8 sps:$4 sm:$0xff]  }
  0x14   : > { %787 = vmatprep.subr.bf16.mxu1 %v1522_v4  ;;  %v1533_v11 = vld [vmem:[%s1800_s25 + $0x40] ss:$8 sps:$4 sm:$0xff]   ;;  %v1552_v12 = vld [vmem:[%s1800_s25 + $0x104] ss:$8 sps:$4 sm:$0xff]   ;;  %v1534_v13 = vld [vmem:[%s1800_s25 + $0x54] ss:$8 sps:$4 sm:$0xff]   ;;  %380 = vperm.xlu0 %1517, %v338_v50  }
  0x15   : > { %v1556_v14 = vld [vmem:[%s1800_s25 + $0x100] ss:$8 sps:$4 sm:$0xff]   ;;  %898 = vmatprep.subr.bf16.mxu0 %v1552_v12  ;;  %v1558_v15 = vld [vmem:[%s1800_s25 + $0x114] ss:$8 sps:$4 sm:$0xff]   ;;  %v1536_v16 = vld [vmem:[%s1800_s25 + $0x50] ss:$8 sps:$4 sm:$0xff]   ;;  %385 = vperm.xlu1 %1518, %v339_v51  }
  0x16   : > { %899 = vmatpush1.bf16.msra.mxu0 %v1556_v14  ;;  %v1537_v17 = vld [vmem:[%s1800_s25 + $0x64] ss:$8 sps:$4 sm:$0xff]   ;;  %v1562_v18 = vld [vmem:[%s1800_s25 + $0x110] ss:$8 sps:$4 sm:$0xff]   ;;  %v1539_v20 = vld [vmem:[%s1800_s25 + $0x60] ss:$8 sps:$4 sm:$0xff]  }
  0x17   : > { %788 = vmatpush1.bf16.msra.mxu1 %v1524_v5  ;;  %900 = vmatprep.subr.bf16.mxu0 %v1558_v15  ;;  %v1564_v19 = vld [vmem:[%s1800_s25 + $0x124] ss:$8 sps:$4 sm:$0xff]   ;;  %v1568_v21 = vld [vmem:[%s1800_s25 + $0x120] ss:$8 sps:$4 sm:$0xff]   ;;  %v1570_v22 = vld [vmem:[%s1800_s25 + $0x134] ss:$8 sps:$4 sm:$0xff]  }
  0x18   : > { %789 = vmatprep.subr.bf16.mxu1 %v1525_v6  ;;  %v1540_v23 = vld [vmem:[%s1800_s25 + $0x74] ss:$8 sps:$4 sm:$0xff]   ;;  %v331_v24 = vld [vmem:[%s1800_s25 + $0x140] sm:$0x33]  ;;  %v1574_v25 = vld [vmem:[%s1800_s25 + $0x130] ss:$8 sps:$4 sm:$0xff]   ;;  %390 = vperm.xlu0 %1517, %v340_v54  }
  0x19   : > { %v1542_v26 = vld [vmem:[%s1800_s25 + $0x70] ss:$8 sps:$4 sm:$0xff]   ;;  %v1404_v27 = vcombine.high %v331_v24, %v331_v24  ;;  %v1403_v28 = vcombine.low %v331_v24, %v331_v24  ;;  %v1543_v29 = vld [vmem:[%s1800_s25 + $0x84] ss:$8 sps:$4 sm:$0xff]   ;;  %v1545_v30 = vld [vmem:[%s1800_s25 + $0x80] ss:$8 sps:$4 sm:$0xff]   ;;  %395 = vperm.xlu1 %1518, %v341_v55  }
  0x1a   : > { %901 = vmatpush1.bf16.msra.mxu0 %v1562_v18  ;;  %v1546_v32 = vld [vmem:[%s1800_s25 + $0x94] ss:$8 sps:$4 sm:$0xff]   ;;  %v1548_v34 = vld [vmem:[%s1800_s25 + $0x90] ss:$8 sps:$4 sm:$0xff]   ;;  %v1549_v35 = vld [vmem:[%s1800_s25 + $0xa4] ss:$8 sps:$4 sm:$0xff]  }
  0x1b   : > { %790 = vmatpush1.bf16.msra.mxu1 %v1527_v7  ;;  %902 = vmatprep.subr.bf16.mxu0 %v1564_v19  ;;  %v780_v31 = vsel %vm778_vm0, %v1403_v28, 0  ;;  %v1551_v36 = vld [vmem:[%s1800_s25 + $0xa0] ss:$8 sps:$4 sm:$0xff]   ;;  %v1554_v39 = vld [vmem:[%s1800_s25 + $0xb4] ss:$8 sps:$4 sm:$0xff]  }
  0x1c   : > { %791 = vmatprep.subr.bf16.mxu1 %v1528_v8  ;;  %v1557_v43 = vld [vmem:[%s1800_s25 + $0xb0] ss:$8 sps:$4 sm:$0xff]   ;;  %v1560_v44 = vld [vmem:[%s1800_s25 + $0xc4] ss:$8 sps:$4 sm:$0xff]   ;;  %v1563_v47 = vld [vmem:[%s1800_s25 + $0xc0] ss:$8 sps:$4 sm:$0xff]   ;;  %400 = vperm.xlu0 %1517, %v342_v59  }
  0x1d   : > { %v1566_v48 = vld [vmem:[%s1800_s25 + $0xd4] ss:$8 sps:$4 sm:$0xff]   ;;  %v1569_v52 = vld [vmem:[%s1800_s25 + $0xd0] ss:$8 sps:$4 sm:$0xff]   ;;  %v1572_v53 = vld [vmem:[%s1800_s25 + $0xe4] ss:$8 sps:$4 sm:$0xff]   ;;  %405 = vperm.xlu1 %1518, %v343_v60  }
  0x1e   : > { %903 = vmatpush1.bf16.msra.mxu0 %v1568_v21  ;;  %v1575_v56 = vld [vmem:[%s1800_s25 + $0xe0] ss:$8 sps:$4 sm:$0xff]   ;;  %v1577_v57 = vld [vmem:[%s1800_s25 + $0xf4] ss:$8 sps:$4 sm:$0xff]   ;;  %v1580_v61 = vld [vmem:[%s1800_s25 + $0xf0] ss:$8 sps:$4 sm:$0xff]  }
  0x1f   : > { %792 = vmatpush1.bf16.msra.mxu1 %v1530_v9  ;;  %904 = vmatprep.subr.bf16.mxu0 %v1570_v22  ;;  %v1585_v2 = vld [vmem:[%s2136_s2 + $0x1c] ss:$12 sps:$4 sm:$0xff]   ;;  %v346_v4 = vld [vmem:[%s2137_s3 + $0x70] sm:$0xff]  ;;  %v1588_v6 = vld [vmem:[%s2136_s2 + $0x18] ss:$12 sps:$4 sm:$0xff]  }
  0x20   : > { %793 = vmatprep.subr.bf16.mxu1 %v1531_v10  ;;  %410 = vperm.xlu0 %1517, %v344_v62   ;;  %v1599_v3 = vld [vmem:[%s2136_s2 + $0x68] ss:$12 sps:$4 sm:$0xff]   ;;  %v347_v5 = vld [vmem:[%s2137_s3 + $0x78] sm:$0xff]  ;;  %v1603_v8 = vld [vmem:[%s2136_s2 + $0x80] ss:$12 sps:$4 sm:$0xff]  }
  0x21   : > { %415 = vperm.xlu1 %1518, %v345_v1   ;;  %v1589_v7 = vld [vmem:[%s2136_s2 + $0x34] ss:$12 sps:$4 sm:$0xff]   ;;  %v1592_v9 = vld [vmem:[%s2136_s2 + $0x30] ss:$12 sps:$4 sm:$0xff]   ;;  %v1593_v10 = vld [vmem:[%s2136_s2 + $0x4c] ss:$12 sps:$4 sm:$0xff]  }
  0x22   : > { %905 = vmatpush1.bf16.msra.mxu0 %v1574_v25  ;;  %v1596_v12 = vld [vmem:[%s2136_s2 + $0x48] ss:$12 sps:$4 sm:$0xff]   ;;  %v1611_v14 = vld [vmem:[%s2136_s2 + $0xb0] ss:$12 sps:$4 sm:$0xff]   ;;  %v1600_v15 = vld [vmem:[%s2136_s2 + $0x60] ss:$12 sps:$4 sm:$0xff]  }
  0x23   : > { %794 = vmatpush1.bf16.msra.mxu1 %v1533_v11  ;;  %1405 = vmatprep.subr.msk.bf16.mxu0 %vm778_vm0, %v1404_v27  ;;  %v1607_v11 = vld [vmem:[%s2136_s2 + $0x98] ss:$12 sps:$4 sm:$0xff]   ;;  %v1608_v18 = vld [vmem:[%s2136_s2 + $0x90] ss:$12 sps:$4 sm:$0xff]  }
  0x24   : > { %795 = vmatprep.subr.bf16.mxu1 %v1534_v13  ;;  %420 = vperm.xlu0 %1517, %v346_v4   ;;  %v1597_v13 = vld [vmem:[%s2136_s2 + $0x64] ss:$12 sps:$4 sm:$0xff]   ;;  %v1609_v19 = vld [vmem:[%s2136_s2 + $0xac] ss:$12 sps:$4 sm:$0xff]  }
  0x25   : > { %425 = vperm.xlu1 %1518, %v347_v5  }
  0x26   : > { %907 = vmatpush1.bf16.msra.mxu0 %v780_v31 }
  0x27   : > { %796 = vmatpush1.bf16.msra.mxu1 %v1536_v16  ;;  %v1604_v16 = vld [vmem:[%s2136_s2 + $0x78] ss:$12 sps:$4 sm:$0xff]  }
  0x28   : > { %797 = vmatprep.subr.bf16.mxu1 %v1537_v17  ;;  %v1605_v17 = vld [vmem:[%s2136_s2 + $0x94] ss:$12 sps:$4 sm:$0xff]  }
  0x29   : > { %1406 = vmatmul.mubr.msk.bf16.vlgmr.msra.gmra.mrb[0].mxu0 %vm753_vm1, %v1584_v33 }
  0x2a   : > { %940 = vmatprep.mubr.bf16.mxu0 %v1749_v0 }
  0x2b   : > { %798 = vmatpush1.bf16.msra.mxu1 %v1539_v20  ;;  %v1612_v20 = vld [vmem:[%s2136_s2 + $0xa8] ss:$12 sps:$4 sm:$0xff]  }
  0x2c   : > { %799 = vmatprep.subr.bf16.mxu1 %v1540_v23 }
  0x2f   : > { %800 = vmatpush1.bf16.msra.mxu1 %v1542_v26 }
  0x30   : > { %801 = vmatprep.subr.bf16.mxu1 %v1543_v29 }
  0x31   : > { %1407 = vmatmul.mubr.msk.bf16.gmra.mrb[4].mxu0 %vm753_vm1, %v1587_v40 }
  0x32   : > { %950 = vmatprep.mubr.bf16.mxu0 %v1749_v0 }
  0x33   : > { %802 = vmatpush1.bf16.msra.mxu1 %v1545_v30 }
  0x34   : > { %803 = vmatprep.subr.bf16.mxu1 %v1546_v32 }
  0x37   : > { %804 = vmatpush1.bf16.msra.mxu1 %v1548_v34 }
  0x38   : > { %805 = vmatprep.subr.bf16.mxu1 %v1549_v35 }
  0x39   : > { %1408 = vmatmul.mubr.msk.bf16.gmra.mrb[8].mxu0 %vm753_vm1, %v1591_v49 }
  0x3a   : > { %960 = vmatprep.mubr.bf16.mxu0 %v1749_v0 }
  0x3b   : > { %806 = vmatpush1.bf16.msra.mxu1 %v1551_v36 }
  0x3c   : > { %807 = vmatprep.subr.bf16.mxu1 %v1554_v39 }
  0x3f   : > { %808 = vmatpush1.bf16.msra.mxu1 %v1557_v43 }
  0x40   : > { %809 = vmatprep.subr.bf16.mxu1 %v1560_v44 }
  0x41   : > { %1409 = vmatmul.mubr.msk.bf16.gmra.mrb[12].mxu0 %vm753_vm1, %v1595_v58 }
  0x42   : > { %970 = vmatprep.mubr.bf16.mxu0 %v1749_v0 }
  0x43   : > { %810 = vmatpush1.bf16.msra.mxu1 %v1563_v47 }
  0x44   : > { %811 = vmatprep.subr.bf16.mxu1 %v1566_v48 }
  0x47   : > { %812 = vmatpush1.bf16.msra.mxu1 %v1569_v52 }
  0x48   : > { %813 = vmatprep.subr.bf16.mxu1 %v1572_v53 }
  0x49   : > { %1410 = vmatmul.mubr.msk.bf16.gmra.mrb[16].mxu0 %vm753_vm1, %v1599_v3 }
  0x4a   : > { %980 = vmatprep.mubr.bf16.mxu0 %v1749_v0 }
  0x4b   : > { %814 = vmatpush1.bf16.msra.mxu1 %v1575_v56 }
  0x4c   : > { %815 = vmatprep.subr.bf16.mxu1 %v1577_v57 }
  0x4f   : > { %816 = vmatpush1.bf16.msra.mxu1 %v1580_v61 }
  0x51   : > { %1411 = vmatmul.mubr.msk.bf16.gmra.mrb[20].mxu0 %vm753_vm1, %v1603_v8 }
  0x52   : > { %818 = vmatmul.mubr.bf16.vlgmr.msra.gmra.mrb[0].mxu1 %v1581_v63  ;;  %990 = vmatprep.mubr.bf16.mxu0 %v1749_v0 }
  0x53   : > { %827 = vmatprep.mubr.bf16.mxu1 %v1585_v2 }
  0x59   : > { %1412 = vmatmul.mubr.msk.bf16.gmra.mrb[24].mxu0 %vm753_vm1, %v1607_v11 }
  0x5a   : > { %828 = vmatmul.mubr.bf16.gmra.mrb[4].mxu1 %v1588_v6  ;;  %1000 = vmatprep.mubr.bf16.mxu0 %v1749_v0  ;;  %v1601_v0 = vld [vmem:[%s2136_s2 + $0x7c] ss:$12 sps:$4 sm:$0xff]  }
  0x5b   : > { %837 = vmatprep.mubr.bf16.mxu1 %v1589_v7 }
  0x61   : > { %1413 = vmatmul.mubr.msk.bf16.gmra.mrb[28].mxu0 %vm753_vm1, %v1611_v14 }
  0x62   : > { %838 = vmatmul.mubr.bf16.gmra.mrb[8].mxu1 %v1592_v9 }
  0x63   : > { %847 = vmatprep.mubr.bf16.mxu1 %v1593_v10 }
  0x6a   : > { %848 = vmatmul.mubr.bf16.gmra.mrb[12].mxu1 %v1596_v12 }
  0x6b   : > { %857 = vmatprep.mubr.bf16.mxu1 %v1597_v13 }
  0x72   : > { %858 = vmatmul.mubr.bf16.gmra.mrb[16].mxu1 %v1600_v15 }
  0x73   : > { %867 = vmatprep.mubr.bf16.mxu1 %v1601_v0 }
  0x7a   : > { %868 = vmatmul.mubr.bf16.gmra.mrb[20].mxu1 %v1604_v16 }
  0x7b   : > { %877 = vmatprep.mubr.bf16.mxu1 %v1605_v17 }
  0x82   : > { %878 = vmatmul.mubr.bf16.gmra.mrb[24].mxu1 %v1608_v18 }
  0x83   : > { %887 = vmatprep.mubr.bf16.mxu1 %v1609_v19 }
  0x87   : > { %v351_v33 = vpop.permute.xlu0 %350  ;;  %v361_v49 = vpop.permute.xlu1 %360 }
  0x8a   : > { %888 = vmatmul.mubr.bf16.gmra.mrb[28].mxu1 %v1612_v20 }
  0x8b   : > { %v356_v39 = vpop.permute.xlu0 %355  ;;  %v366_v60 = vpop.permute.xlu1 %365 }
  0x8f   : > { %v371_v14 = vpop.permute.xlu0 %370  ;;  %v376_v18 = vpop.permute.xlu1 %375 }
  0xfc   : > { %v932_v21 = vpop.f32.mrb[0].mxu0 }
  0xfd   : > { %v934_v22 = vpop.f32.mrb[1].mxu0 }
  0xfe   : > { %v936_v23 = vpop.f32.mrb[2].mxu0 }
  0xff   : > { %v938_v24 = vpop.f32.mrb[3].mxu0 }
 0x104   : > { %v942_v25 = vpop.f32.mrb[4].mxu0 }
 0x105   : > { %v944_v26 = vpop.f32.mrb[5].mxu0 }
 0x106   : > { %v946_v27 = vpop.f32.mrb[6].mxu0 }
 0x107   : > { %v948_v28 = vpop.f32.mrb[7].mxu0 }
 0x10c   : > { %v952_v29 = vpop.f32.mrb[8].mxu0 }
 0x10d   : > { %v1975_v30 = vpop.f32.mrb[9].mxu0 }
 0x10e   : > { %v1977_v31 = vpop.f32.mrb[10].mxu0 }
 0x10f   : > { %v1979_v32 = vpop.f32.mrb[11].mxu0 }
 0x114   : > { %v1981_v34 = vpop.f32.mrb[12].mxu0 }
 0x115   : > { %v1983_v35 = vpop.f32.mrb[13].mxu0 }
 0x116   : > { %v1985_v36 = vpop.f32.mrb[14].mxu0 }
 0x117   : > { %v1987_v37 = vpop.f32.mrb[15].mxu0 }
 0x11c   : > { %v1989_v47 = vpop.f32.mrb[16].mxu0 }
 0x11d   : > { %v1991_v51 = vpop.f32.mrb[17].mxu0 }
 0x11e   : > { %v1993_v53 = vpop.f32.mrb[18].mxu0 }
 0x11f   : > { %v1995_v55 = vpop.f32.mrb[19].mxu0 }
 0x124   : > { %v1997_v4 = vpop.f32.mrb[20].mxu0 }
 0x125   : > { %v819_v38 = vpop.f32.mrb[0].mxu1  ;;  %v1999_v8 = vpop.f32.mrb[21].mxu0 }
 0x126   : > { %v820_v40 = vadd.f32 %v819_v38, %v351_v33  ;;  %v821_v41 = vpop.f32.mrb[1].mxu1  ;;  %v2001_v10 = vpop.f32.mrb[22].mxu0 }
 0x127   : > { %v822_v42 = vadd.f32 %v821_v41, %v351_v33  ;;  %v823_v43 = vpop.f32.mrb[2].mxu1  ;;  %v2003_v12 = vpop.f32.mrb[23].mxu0 }
 0x128   : > { %v933_v44 = vadd.f32 %v932_v21, %v820_v40  ;;  %v824_v45 = vadd.f32 %v823_v43, %v356_v39  ;;  %v825_v46 = vpop.f32.mrb[3].mxu1 }
 0x129   : > { %v935_v48 = vadd.f32 %v934_v22, %v822_v42  ;;  %v826_v50 = vadd.f32 %v825_v46, %v356_v39 }
 0x12a   : > { %v937_v52 = vadd.f32 %v936_v23, %v824_v45  ;;  %v1414_v59 = vmul.f32 -1.442695, %v933_v44  ;;  %v381_v45 = vpop.permute.xlu0 %380 }
 0x12b   : > { %v939_v54 = vadd.f32 %v938_v24, %v826_v50  ;;  %v1415_v63 = vmul.f32 -1.442695, %v935_v48 }
 0x12c   : > { %v1416_v5 = vmul.f32 -1.442695, %v937_v52  ;;  %1613 = vpow2.f32 %v1414_v59 }
 0x12d   : > { %v829_v56 = vpop.f32.mrb[4].mxu1  ;;  %1615 = vpow2.f32 %v1415_v63  ;;  %v1417_v13 = vmul.f32 -1.442695, %v939_v54  ;;  %v386_v54 = vpop.permute.xlu1 %385 }
 0x12e   : > { %v830_v57 = vadd.f32 %v829_v56, %v361_v49  ;;  %v831_v58 = vpop.f32.mrb[5].mxu1  ;;  %1617 = vpow2.f32 %v1416_v5 }
 0x12f   : > { %v832_v61 = vadd.f32 %v831_v58, %v361_v49  ;;  %v833_v62 = vpop.f32.mrb[6].mxu1  ;;  %1619 = vpow2.f32 %v1417_v13 }
 0x130   : > { %v943_v1 = vadd.f32 %v942_v25, %v830_v57  ;;  %v834_v2 = vadd.f32 %v833_v62, %v366_v60  ;;  %v835_v3 = vpop.f32.mrb[7].mxu1  ;;  %v2005_v25 = vpop.f32.mrb[24].mxu0 }
 0x131   : > { %v945_v6 = vadd.f32 %v944_v26, %v832_v61  ;;  %v836_v7 = vadd.f32 %v835_v3, %v366_v60  ;;  %v2008_v33 = vpop.f32.mrb[25].mxu0 }
 0x132   : > { %v947_v9 = vadd.f32 %v946_v27, %v834_v2  ;;  %v1418_v0 = vmul.f32 -1.442695, %v943_v1  ;;  %v2011_v40 = vpop.f32.mrb[26].mxu0 }
 0x133   : > { %v949_v11 = vadd.f32 %v948_v28, %v836_v7  ;;  %v1419_v21 = vmul.f32 -1.442695, %v945_v6 }
 0x134   : > { %v1420_v26 = vmul.f32 -1.442695, %v947_v9  ;;  %1621 = vpow2.f32 %v1418_v0 }
 0x135   : > { %v839_v15 = vpop.f32.mrb[8].mxu1  ;;  %v1421_v38 = vmul.f32 -1.442695, %v949_v11  ;;  %1623 = vpow2.f32 %v1419_v21  ;;  %v396_v21 = vpop.permute.xlu1 %395 }
 0x136   : > { %v840_v16 = vadd.f32 %v839_v15, %v371_v14  ;;  %v841_v17 = vpop.f32.mrb[9].mxu1  ;;  %v1614_v44 = vpop.eup %1613  ;;  %1625 = vpow2.f32 %v1420_v26 }
 0x137   : > { %v842_v19 = vadd.f32 %v841_v17, %v371_v14  ;;  %v843_v20 = vpop.f32.mrb[10].mxu1  ;;  %v1616_v48 = vpop.eup %1615  ;;  %1627 = vpow2.f32 %v1421_v38 }
 0x138   : > { %v953_v22 = vadd.f32 %v952_v29, %v840_v16  ;;  %v844_v23 = vadd.f32 %v843_v20, %v376_v18  ;;  %v845_v24 = vpop.f32.mrb[11].mxu1  ;;  %v2014_v29 = vpop.f32.mrb[27].mxu0  ;;  %v1084_v62 = vadd.f32 1.0, %v1616_v48 }
 0x139   : > { %v955_v27 = vadd.f32 %v1975_v30, %v842_v19  ;;  %v846_v28 = vadd.f32 %v845_v24, %v376_v18  ;;  %v2017_v61 = vpop.f32.mrb[28].mxu0  ;;  %v391_v15 = vpop.permute.xlu0 %390 }
 0x13a   : > { %v957_v39 = vadd.f32 %v1977_v31, %v844_v23  ;;  %v1422_v41 = vmul.f32 -1.442695, %v953_v22  ;;  %v1618_v31 = vpop.eup %1617  ;;  %v2020_v2 = vpop.f32.mrb[29].mxu0 }
 0x13b   : > { %v959_v42 = vadd.f32 %v1979_v32, %v846_v28  ;;  %v1423_v43 = vmul.f32 -1.442695, %v955_v27  ;;  %v1083_v32 = vadd.f32 1.0, %v1614_v44  ;;  %v1620_v3 = vpop.eup %1619  ;;  %v1085_v5 = vadd.f32 1.0, %v1618_v31  ;;  %v2023_v7 = vpop.f32.mrb[30].mxu0 }
 0x13c   : > { %v1424_v30 = vmul.f32 -1.442695, %v957_v39  ;;  %1629 = vpow2.f32 %v1422_v41  ;;  %v2026_v11 = vpop.f32.mrb[31].mxu0 }
 0x13d   : > { %v849_v46 = vpop.f32.mrb[12].mxu1  ;;  %v1425_v49 = vmul.f32 -1.442695, %v959_v42  ;;  %1631 = vpow2.f32 %v1423_v43 }
 0x13e   : > { %v850_v50 = vadd.f32 %v849_v46, %v381_v45  ;;  %v851_v52 = vpop.f32.mrb[13].mxu1  ;;  %1633 = vpow2.f32 %v1424_v30  ;;  %v1622_v13 = vpop.eup %1621 }
 0x13f   : > { %v852_v56 = vadd.f32 %v851_v52, %v381_v45  ;;  %v853_v57 = vpop.f32.mrb[14].mxu1  ;;  %1635 = vpow2.f32 %v1425_v49  ;;  %v1624_v16 = vpop.eup %1623  ;;  %v1087_v20 = vadd.f32 1.0, %v1622_v13 }
 0x140   : > { %v963_v58 = vadd.f32 %v1981_v34, %v850_v50  ;;  %v854_v59 = vadd.f32 %v853_v57, %v386_v54  ;;  %v855_v60 = vpop.f32.mrb[15].mxu1  ;;  %1637 = vrcp.f32 %v1083_v32  ;;  %v1088_v39 = vadd.f32 1.0, %v1624_v16  ;;  %v401_v52 = vpop.permute.xlu0 %400 }
 0x141   : > { %v965_v63 = vadd.f32 %v1983_v35, %v852_v56  ;;  %v856_v1 = vadd.f32 %v855_v60, %v386_v54  ;;  %1639 = vrcp.f32 %v1084_v62  ;;  %v1086_v35 = vadd.f32 1.0, %v1620_v3 }
 0x142   : > { %v967_v6 = vadd.f32 %v1985_v36, %v854_v59  ;;  %v1426_v9 = vmul.f32 -1.442695, %v963_v58  ;;  %1641 = vrcp.f32 %v1085_v5  ;;  %v1626_v36 = vpop.eup %1625  ;;  %v406_v58 = vpop.permute.xlu1 %405 }
 0x143   : > { %v969_v34 = vadd.f32 %v1987_v37, %v856_v1  ;;  %v1427_v14 = vmul.f32 -1.442695, %v965_v63  ;;  %v1628_v23 = vpop.eup %1627  ;;  %v1089_v44 = vadd.f32 1.0, %v1626_v36 }
 0x144   : > { %v1428_v17 = vmul.f32 -1.442695, %v967_v6  ;;  %1643 = vpow2.f32 %v1426_v9  ;;  %v1090_v46 = vadd.f32 1.0, %v1628_v23  ;;  %v411_v36 = vpop.permute.xlu0 %410 }
 0x145   : > { %v859_v0 = vpop.f32.mrb[16].mxu1  ;;  %1645 = vpow2.f32 %v1427_v14  ;;  %v1429_v24 = vmul.f32 -1.442695, %v969_v34 }
 0x146   : > { %v860_v18 = vadd.f32 %v859_v0, %v391_v15  ;;  %v861_v19 = vpop.f32.mrb[17].mxu1  ;;  %v1630_v38 = vpop.eup %1629  ;;  %1647 = vrcp.f32 %v1086_v35 }
 0x147   : > { %v862_v22 = vadd.f32 %v861_v19, %v391_v15  ;;  %v863_v37 = vpop.f32.mrb[18].mxu1  ;;  %v1632_v43 = vpop.eup %1631  ;;  %1649 = vpow2.f32 %v1428_v17 }
 0x148   : > { %v973_v26 = vadd.f32 %v1989_v47, %v860_v18  ;;  %v864_v27 = vadd.f32 %v863_v37, %v396_v21  ;;  %v865_v28 = vpop.f32.mrb[19].mxu1  ;;  %v1634_v30 = vpop.eup %1633  ;;  %1651 = vrcp.f32 %v1087_v20  ;;  %v1091_v47 = vadd.f32 1.0, %v1630_v38 }
 0x149   : > { %v975_v41 = vadd.f32 %v1991_v51, %v862_v22  ;;  %v866_v42 = vadd.f32 %v865_v28, %v396_v21  ;;  %v1636_v49 = vpop.eup %1635  ;;  %1653 = vpow2.f32 %v1429_v24  ;;  %v1092_v50 = vadd.f32 1.0, %v1632_v43  ;;  %v416_v23 = vpop.permute.xlu1 %415 }
 0x14a   : > { %v977_v45 = vadd.f32 %v1993_v53, %v864_v27  ;;  %1655 = vrcp.f32 %v1088_v39  ;;  %v2032_v54 = vpop.eup %1637  ;;  %v1093_v51 = vadd.f32 1.0, %v1634_v30  ;;  %v1094_v53 = vadd.f32 1.0, %v1636_v49 }
 0x14b   : > { %v979_v48 = vadd.f32 %v1995_v55, %v866_v42  ;;  %1657 = vrcp.f32 %v1089_v44  ;;  %v2034_v32 = vpop.eup %1639  ;;  %v1430_v62 = vmul.f32 -1.442695, %v973_v26  ;;  %v1431_v6 = vmul.f32 -1.442695, %v975_v41 }
 0x14c   : > { %1659 = vrcp.f32 %v1090_v46  ;;  %v2036_v60 = vpop.eup %1641  ;;  %v1432_v14 = vmul.f32 -1.442695, %v977_v45 }
 0x14d   : > { %v869_v31 = vpop.f32.mrb[20].mxu1  ;;  %1661 = vrcp.f32 %v1091_v47  ;;  %v1433_v0 = vmul.f32 -1.442695, %v979_v48 }
 0x14e   : > { %v870_v56 = vadd.f32 %v869_v31, %v401_v52  ;;  %v871_v57 = vpop.f32.mrb[21].mxu1  ;;  %v1644_v5 = vpop.eup %1643  ;;  %1663 = vrcp.f32 %v1092_v50 }
 0x14f   : > { %v872_v59 = vadd.f32 %v871_v57, %v401_v52  ;;  %v873_v55 = vpop.f32.mrb[22].mxu1  ;;  %v1646_v13 = vpop.eup %1645  ;;  %1665 = vrcp.f32 %v1093_v51  ;;  %v1095_v17 = vadd.f32 1.0, %v1644_v5 }
 0x150   : > { %v983_v63 = vadd.f32 %v1997_v4, %v870_v56  ;;  %v874_v1 = vadd.f32 %v873_v55, %v406_v58  ;;  %v875_v3 = vpop.f32.mrb[23].mxu1  ;;  %v2041_v15 = vpop.eup %1647  ;;  %1667 = vrcp.f32 %v1094_v53  ;;  %v1096_v19 = vadd.f32 1.0, %v1646_v13 }
 0x151   : > { %v985_v9 = vadd.f32 %v1999_v8, %v872_v59  ;;  %v876_v34 = vadd.f32 %v875_v3, %v406_v58  ;;  %v1650_v4 = vpop.eup %1649  ;;  %1669 = vpow2.f32 %v1430_v62 }
 0x152   : > { %v987_v35 = vadd.f32 %v2001_v10, %v874_v1  ;;  %v2044_v18 = vpop.eup %1651  ;;  %1671 = vpow2.f32 %v1431_v6  ;;  %v1097_v37 = vadd.f32 1.0, %v1650_v4  ;;  %v1434_v27 = vmul.f32 -1.442695, %v983_v63 }
 0x153   : > { %v989_v16 = vadd.f32 %v2003_v12, %v876_v34  ;;  %v1654_v20 = vpop.eup %1653  ;;  %1673 = vpow2.f32 %v1432_v14  ;;  %v1435_v30 = vmul.f32 -1.442695, %v985_v9  ;;  %v1163_v34 = vld [vmem:[%s2069_s14] sm:$0xff] }
 0x154   : > { %v2046_v10 = vpop.eup %1655  ;;  %1675 = vpow2.f32 %v1433_v0  ;;  %v1098_v42 = vadd.f32 1.0, %v1654_v20  ;;  %v1436_v56 = vmul.f32 -1.442695, %v987_v35 }
 0x155   : > { %v879_v8 = vpop.f32.mrb[24].mxu1  ;;  %v2048_v26 = vpop.eup %1657  ;;  %1677 = vrcp.f32 %v1095_v17  ;;  %v1437_v59 = vmul.f32 -1.442695, %v989_v16 }
 0x156   : > { %v880_v21 = vadd.f32 %v879_v8, %v411_v36  ;;  %v881_v22 = vpop.f32.mrb[25].mxu1  ;;  %v2051_v41 = vpop.eup %1659  ;;  %1679 = vrcp.f32 %v1096_v19  ;;  %v1165_v19 = vld [vmem:[%s2069_s14 + $0x10] sm:$0xff]  ;;  %v1167_v8 = vld [vmem:[%s2069_s14 + $0x20] sm:$0xff] }
 0x157   : > { %v882_v24 = vadd.f32 %v881_v22, %v411_v36  ;;  %v883_v12 = vpop.f32.mrb[26].mxu1  ;;  %v1662_v45 = vpop.eup %1661  ;;  %v1166_v36 = vld [vmem:[%s2069_s14 + $0x18] sm:$0xff] }
 0x158   : > { %v993_v28 = vadd.f32 %v2005_v25, %v880_v21  ;;  %v884_v38 = vadd.f32 %v883_v12, %v416_v23  ;;  %v885_v39 = vpop.f32.mrb[27].mxu1  ;;  %v2055_v48 = vpop.eup %1663  ;;  %v1171_v16 = vmul.f32 %v1662_v45, %v1163_v34 }
 0x159   : > { %v995_v43 = vadd.f32 %v2008_v33, %v882_v24  ;;  %v886_v44 = vadd.f32 %v885_v39, %v416_v23  ;;  %v2058_v49 = vpop.eup %1665  ;;  %v421_v33 = vpop.permute.xlu0 %420  ;;  %v1170_v23 = vld [vmem:[%s2069_s14 + $0x38] sm:$0xff] }
 0x15a   : > { %1681 = vtanh.f32 %v993_v28  ;;  %v997_v46 = vadd.f32 %v2011_v40, %v884_v38  ;;  %v2063_v47 = vpop.eup %1667 }
 0x15b   : > { %1683 = vrcp.f32 %v1097_v37  ;;  %v999_v25 = vadd.f32 %v2014_v29, %v886_v44  ;;  %v1670_v52 = vpop.eup %1669  ;;  %v426_v29 = vpop.permute.xlu1 %425  ;;  %v1168_v37 = vld [vmem:[%s2069_s14 + $0x28] sm:$0xff] }
 0x15c   : > { %1685 = vpow2.f32 %v1434_v27  ;;  %v1672_v51 = vpop.eup %1671  ;;  %v1099_v3 = vadd.f32 1.0, %v1670_v52 }
 0x15d   : > { %1687 = vrcp.f32 %v1098_v42  ;;  %v889_v50 = vpop.f32.mrb[28].mxu1  ;;  %v1674_v58 = vpop.eup %1673  ;;  %v1100_v13 = vadd.f32 1.0, %v1672_v51 }
 0x15e   : > { %1689 = vpow2.f32 %v1435_v30  ;;  %v890_v31 = vadd.f32 %v889_v50, %v421_v33  ;;  %v891_v40 = vpop.f32.mrb[29].mxu1  ;;  %v1676_v1 = vpop.eup %1675  ;;  %v1101_v20 = vadd.f32 1.0, %v1674_v58  ;;  %v1174_v30 = vmul.f32 %v2063_v47, %v1166_v36 }
 0x15f   : > { %1691 = vtanh.f32 %v995_v43  ;;  %v892_v57 = vadd.f32 %v891_v40, %v421_v33  ;;  %v893_v53 = vpop.f32.mrb[30].mxu1  ;;  %v1678_v9 = vpop.eup %1677  ;;  %v1102_v24 = vadd.f32 1.0, %v1676_v1  ;;  %v1173_v43 = vmul.f32 %v2058_v49, %v1165_v19 }
 0x160   : > { %1693 = vtanh.f32 %v997_v46  ;;  %v1003_v55 = vadd.f32 %v2017_v61, %v890_v31  ;;  %v894_v62 = vadd.f32 %v893_v53, %v426_v29  ;;  %v895_v63 = vpop.f32.mrb[31].mxu1  ;;  %v2075_v35 = vpop.eup %1679 }
 0x161   : > { %1695 = vtanh.f32 %v999_v25  ;;  %v1005_v5 = vadd.f32 %v2020_v2, %v892_v57  ;;  %v896_v6 = vadd.f32 %v895_v63, %v426_v29 }
 0x162   : > { %1697 = vtanh.f32 %v1003_v55  ;;  %v1007_v14 = vadd.f32 %v2023_v7, %v894_v62  ;;  %v1164_v7 = vld [vmem:[%s2069_s14 + $0x8] sm:$0xff] }
 0x163   : > { %1699 = vpow2.f32 %v1436_v56  ;;  %v1009_v61 = vadd.f32 %v2026_v11, %v896_v6  ;;  %v1172_v38 = vmul.f32 %v2055_v48, %v1164_v7  ;;  %v1175_v48 = vmul.f32 %v1678_v9, %v1167_v8 }
 0x164   : > { %v1682_v0 = vpop.eup %1681  ;;  %1701 = vpow2.f32 %v1437_v59 }
 0x165   : > { %v2078_v2 = vpop.eup %1683  ;;  %1703 = vrcp.f32 %v1099_v3  ;;  %v1179_v4 = vmul.f32 %v1682_v0, %v2032_v54  ;;  %v1169_v54 = vld [vmem:[%s2069_s14 + $0x30] sm:$0xff] }
 0x166   : > { %v1686_v17 = vpop.eup %1685  ;;  %1705 = vrcp.f32 %v1100_v13  ;;  %v1177_v53 = vmul.f32 %v2078_v2, %v1169_v54 }
 0x167   : > { %v2088_v11 = vpop.eup %1687  ;;  %v1187_v21 = vadd.f32 %v1179_v4, %v1171_v16  ;;  %1707 = vtanh.f32 %v1005_v5  ;;  %v1103_v27 = vadd.f32 1.0, %v1686_v17 }
 0x168   : > { %v1690_v22 = vpop.eup %1689  ;;  %1709 = vtanh.f32 %v1007_v14 }
 0x169   : > { %v1692_v12 = vpop.eup %1691  ;;  %1711 = vtanh.f32 %v1187_v21  ;;  %1219 = vst [vmem:[%s2085_s16] sm:$0xff] %v1187_v21  ;;  %v1104_v40 = vadd.f32 1.0, %v1690_v22 }
 0x16a   : > { %v1694_v28 = vpop.eup %1693  ;;  %v1180_v39 = vmul.f32 %v1692_v12, %v2034_v32  ;;  %1713 = vtanh.f32 %v1009_v61 }
 0x16b   : > { %v1696_v42 = vpop.eup %1695  ;;  %1715 = vrcp.f32 %v1101_v20  ;;  %v1181_v44 = vmul.f32 %v1694_v28, %v2036_v60 }
 0x16c   : > { %v1698_v45 = vpop.eup %1697  ;;  %1717 = vrcp.f32 %v1102_v24  ;;  %v1188_v46 = vadd.f32 %v1180_v39, %v1172_v38  ;;  %v1182_v25 = vmul.f32 %v1696_v42, %v2041_v15 }
 0x16d   : > { %v1700_v33 = vpop.eup %1699  ;;  %1719 = vrcp.f32 %v1103_v27  ;;  %v1189_v32 = vadd.f32 %v1181_v44, %v1173_v43  ;;  %v1183_v50 = vmul.f32 %v1698_v45, %v2044_v18  ;;  %v1176_v18 = vmul.f32 %v2075_v35, %v1168_v37 }
 0x16e   : > { %v1702_v49 = vpop.eup %1701  ;;  %1721 = vtanh.f32 %v1188_v46  ;;  %1220 = vst [vmem:[%s2085_s16 + $0x8] sm:$0xff] %v1188_v46  ;;  %v1190_v60 = vadd.f32 %v1182_v25, %v1174_v30  ;;  %v1105_v51 = vadd.f32 1.0, %v1700_v33 }
 0x16f   : > { %v1704_v52 = vpop.eup %1703  ;;  %1723 = vtanh.f32 %v1189_v32  ;;  %1221 = vst [vmem:[%s2085_s16 + $0x10] sm:$0xff] %v1189_v32  ;;  %v1191_v47 = vadd.f32 %v1183_v50, %v1175_v48  ;;  %v1106_v55 = vadd.f32 1.0, %v1702_v49 }
 0x170   : > { %v1706_v31 = vpop.eup %1705  ;;  %1725 = vtanh.f32 %v1190_v60  ;;  %1222 = vst [vmem:[%s2085_s16 + $0x18] sm:$0xff] %v1190_v60 }
 0x171   : > { %v1708_v15 = vpop.eup %1707  ;;  %1727 = vtanh.f32 %v1191_v47  ;;  %1223 = vst [vmem:[%s2085_s16 + $0x20] sm:$0xff] %v1191_v47 }
 0x172   : > { %v1710_v29 = vpop.eup %1709  ;;  %v1184_v56 = vmul.f32 %v1708_v15, %v2046_v10  ;;  %1729 = vrcp.f32 %v1104_v40  ;;  %v1178_v10 = vmul.f32 %v2088_v11, %v1170_v23 }
 0x173   : > { %v1712_v57 = vpop.eup %1711  ;;  %v1185_v58 = vmul.f32 %v1710_v29, %v2048_v26  ;;  %1731 = vrcp.f32 %v1105_v51 }
 0x174   : > { %v1714_v59 = vpop.eup %1713  ;;  %v1203_v62 = vmul.f32 %v1712_v57, %v1704_v52  ;;  %v1192_v63 = vadd.f32 %v1184_v56, %v1176_v18 }
 0x175   : > { %v1716_v1 = vpop.eup %1715  ;;  %v1193_v3 = vadd.f32 %v1185_v58, %v1177_v53  ;;  %v1186_v5 = vmul.f32 %v1714_v59, %v2051_v41 }
 0x176   : > { %v1718_v6 = vpop.eup %1717  ;;  %1211 = vst [vmem:[%s2115_s20] sm:$0xff] %v1203_v62  ;;  %1733 = vtanh.f32 %v1192_v63  ;;  %1224 = vst [vmem:[%s2085_s16 + $0x28] sm:$0xff] %v1192_v63 }
 0x177   : > { %v1720_v26 = vpop.eup %1719  ;;  %1735 = vtanh.f32 %v1193_v3  ;;  %1225 = vst [vmem:[%s2085_s16 + $0x30] sm:$0xff] %v1193_v3  ;;  %v1194_v9 = vadd.f32 %v1186_v5, %v1178_v10 }
 0x178   : > { %v1722_v34 = vpop.eup %1721  ;;  %1737 = vrcp.f32 %v1106_v55 }
 0x179   : > { %v1724_v13 = vpop.eup %1723  ;;  %v1204_v14 = vmul.f32 %v1722_v34, %v1706_v31  ;;  %1739 = vtanh.f32 %v1194_v9  ;;  %1226 = vst [vmem:[%s2085_s16 + $0x38] sm:$0xff] %v1194_v9 }
 0x17a   : > { %v1726_v35 = vpop.eup %1725  ;;  %v1205_v41 = vmul.f32 %v1724_v13, %v1716_v1 }
 0x17b   : > { %v1728_v61 = vpop.eup %1727  ;;  %1212 = vst [vmem:[%s2115_s20 + $0x8] sm:$0xff] %v1204_v14  ;;  %v1206_v0 = vmul.f32 %v1726_v35, %v1718_v6 }
 0x17c   : > { %1213 = vst [vmem:[%s2115_s20 + $0x10] sm:$0xff] %v1205_v41  ;;  %v1207_v2 = vmul.f32 %v1728_v61, %v1720_v26  ;;  %v1730_v16 = vpop.eup %1729 }
 0x17d   : > { %1214 = vst [vmem:[%s2115_s20 + $0x18] sm:$0xff] %v1206_v0  ;;  %v1732_v4 = vpop.eup %1731 }
 0x17e   : > { %1215 = vst [vmem:[%s2115_s20 + $0x20] sm:$0xff] %v1207_v2 }
 0x180   : > { %v1734_v17 = vpop.eup %1733 }
 0x181   : > { %v1736_v7 = vpop.eup %1735  ;;  %v1208_v11 = vmul.f32 %v1734_v17, %v1730_v16 }
 0x182   : > { %v1738_v19 = vpop.eup %1737  ;;  %v1209_v36 = vmul.f32 %v1736_v7, %v1732_v4 }
 0x183   : > { %v1740_v8 = vpop.eup %1739  ;;  %1216 = vst [vmem:[%s2115_s20 + $0x28] sm:$0xff] %v1208_v11 }
 0x184   : > { %1217 = vst [vmem:[%s2115_s20 + $0x30] sm:$0xff] %v1209_v36  ;;  %v1210_v20 = vmul.f32 %v1740_v8, %v1738_v19 }
 0x186   : > { %1218 = vst [vmem:[%s2115_s20 + $0x38] sm:$0xff] %v1210_v20 }
 0x187 PF: > { %s16_s18 = sadd.s32 1, %s1747_s18  }
 0x188   : > { %p13_p4 = scmp.ge.s32.totalorder %s16_s18, 4  }
 0x18a   :  { %15 = sbr.rel (!%p13_p4) target bundleno = 1 (0x1), region = 81 }

</bundles_post_ra>
